<compile_context>
chip_gen: v7x
topology: tpu7x:2x2x1
jax: 0.10.0
libtpu: 0.0.40
codegen_flags: <defaults>
</compile_context>

<pallas_src>
import functools
import math

import jax
import jax.numpy as jnp
from jax.experimental import pallas as pl
from jax.experimental.pallas import tpu as pltpu


def resid_fused_kernel(n_ids_ref, k_ids_ref, x_ref, w_ref, b_ref, o_ref, *,
                       x_resident):
    """One compressed-grid step: o[n-block] += x[k-slice] @ W[k-tile, n-tile].

    n_ids_ref / k_ids_ref: scalar-prefetched (SMEM) lists of the non-zero
    causal tile coordinates (structurally-zero W tiles never enter the grid).
    The output block index depends only on n, so o_ref stays VMEM-resident
    across the consecutive K steps of each N block and is used directly as the
    f32 accumulator (seeded with the bias at k == 0).
    """
    i = pl.program_id(0)
    k = k_ids_ref[i]

    @pl.when(k == 0)
    def _init():
        # First K tile for this output block: seed with the bias (added once).
        o_ref[...] = jnp.broadcast_to(b_ref[...].astype(jnp.float32),
                                      o_ref.shape)

    if x_resident:
        # x lives in VMEM as (kt, B, tile_k); dynamic index on the leading dim.
        xk = x_ref[k]
    else:
        xk = x_ref[...]

    # Weights stream from HBM in their storage dtype (bf16 by default: ~2x
    # less HBM traffic on a bandwidth-bound kernel); upcast + f32 accumulate.
    o_ref[...] += jnp.dot(xk, w_ref[...].astype(jnp.float32),
                          preferred_element_type=jnp.float32)


def _vmem_capacity_bytes():
    try:
        info = pltpu.get_tpu_info()
        cap = getattr(info, "vmem_capacity_bytes", None)
        if cap:
            return int(cap)
    except Exception:
        pass
    return 64 * 2**20   # conservative: v7x per-TensorCore VMEM


def _pick_tile(dim, cap):
    """Largest tile <= cap dividing `dim` that is a multiple of 256 (MXU depth
    on v6e/v7x), else of 128 (lane width), else the full dimension."""
    if dim <= cap:
        return dim
    for unit in (256, 128):
        t = (cap // unit) * unit
        while t >= unit:
            if dim % t == 0:
                return t
            t -= unit
    # TODO(synk): no 128-aligned divisor (e.g. I/O not power-of-two sized);
    # falls back to a full-dim block, which for very large D or N should
    # instead be padded to a 128 multiple (compile-time VMEM risk, not a
    # wrong-answer risk).
    return dim


def resid_linear_regression_forward(x, W_fused, b_fused, *,
                                    tile_k=None, tile_n=None):
    """resid_only=True path of ResidLinearRegression.forward.

    x:       (B, H, I) float32
    W_fused: (H*I, H*O) per-step Linear weights packed column-wise with causal
             zero padding (W_fused[(t+1)*I:, t*O:(t+1)*O] == 0).  Any dtype;
             bf16 recommended (dominant HBM stream), upcast in-kernel.
    b_fused: (H*O,) float32
    Returns  resid_hat: (B, H, O) float32  (== torch.stack(resid_hat, 1)).
    """
    B, H, I = x.shape
    D = H * I
    N = W_fused.shape[-1]
    assert W_fused.shape == (D, N) and N % H == 0
    O = N // H

    x_flat = x.reshape(B, D).astype(jnp.float32)
    b2 = b_fused.reshape(1, N).astype(jnp.float32)
    w_bytes = jnp.dtype(W_fused.dtype).itemsize

    vmem_cap = _vmem_capacity_bytes()
    vmem_ceiling = (3 * vmem_cap) // 4          # leave headroom (esp. v7x 64 MiB)

    # ---- Tile selection -----------------------------------------------------
    if tile_k is None or tile_n is None:
        if D * N * w_bytes <= 8 * 2**20:
            # Small problem: single full-block grid step, zero tiling overhead.
            auto_k, auto_n = D, N
        else:
            cap = 1024 if vmem_cap >= 96 * 2**20 else 512   # v5e/v6e vs v7x
            auto_k, auto_n = _pick_tile(D, cap), _pick_tile(N, cap)
        tile_k = auto_k if tile_k is None else tile_k
        tile_n = auto_n if tile_n is None else tile_n
    assert D % tile_k == 0 and N % tile_n == 0
    kt, nt = D // tile_k, N // tile_n

    # ---- Compressed causal grid (scalar prefetch) ---------------------------
    # W[r, c] == 0 iff r >= ((c // O) + 1) * I, so the (n, k) tile is non-zero
    # iff its first row lies below the last non-zero row of its last column.
    pairs = []
    for n in range(nt):
        last_col = (n + 1) * tile_n - 1
        nz_rows = ((last_col // O) + 1) * I       # rows [0, nz_rows) may be != 0
        k_max = -(-nz_rows // tile_k)             # ceil division
        pairs.extend((n, k) for k in range(k_max))
    n_ids = jnp.asarray([p[0] for p in pairs], dtype=jnp.int32)
    k_ids = jnp.asarray([p[1] for p in pairs], dtype=jnp.int32)
    nnz = len(pairs)

    # ---- x placement: VMEM-resident slab when small -------------------------
    x_resident = (B * D * 4) <= 2 * 2**20
    if x_resident:
        # (B, D) -> (kt, B, tile_k): the kernel picks the K slice by leading-dim
        # index, so x is DMA'd once and never re-streamed per grid step.
        x_arg = jnp.swapaxes(x_flat.reshape(B, kt, tile_k), 0, 1)
        x_spec = pl.BlockSpec((kt, B, tile_k), lambda i, nids, kids: (0, 0, 0))
        x_block_bytes = kt * B * tile_k * 4
    else:
        x_arg = x_flat
        x_spec = pl.BlockSpec((B, tile_k), lambda i, nids, kids: (0, kids[i]))
        x_block_bytes = B * tile_k * 4

    # ---- VMEM budget: double-buffered x / W / bias tiles + resident output --
    vmem_need = (2 * (x_block_bytes + tile_k * tile_n * w_bytes + tile_n * 4)
                 + 2 * B * tile_n * 4)
    vmem_limit = int(min(max(2 * vmem_need, 16 * 2**20), vmem_ceiling))

    kernel = functools.partial(resid_fused_kernel, x_resident=x_resident)

    out = pl.pallas_call(
        kernel,
        out_shape=jax.ShapeDtypeStruct((B, N), jnp.float32),
        grid_spec=pltpu.PrefetchScalarGridSpec(
            num_scalar_prefetch=2,
            grid=(nnz,),
            in_specs=[
                x_spec,                                                   # x
                pl.BlockSpec((tile_k, tile_n),
                             lambda i, nids, kids: (kids[i], nids[i])),   # W
                pl.BlockSpec((1, tile_n),
                             lambda i, nids, kids: (0, nids[i])),         # bias
            ],
            out_specs=pl.BlockSpec((B, tile_n),
                                   lambda i, nids, kids: (0, nids[i])),
        ),
        # 1-D compressed grid accumulates consecutive steps into the same
        # output block -> reduction semantics ("arbitrary").
        compiler_params=pltpu.CompilerParams(
            dimension_semantics=("arbitrary",),
            vmem_limit_bytes=vmem_limit,
        ),
    )(n_ids, k_ids, x_arg, W_fused, b2)

    # (B, H*O) -> (B, H, O): lane-dense output, free reshape, no transpose.
    return out.reshape(B, H, O)


def build_params(key, H, I, O, weight_dtype=jnp.bfloat16):
    """Per-step Linear params (PyTorch nn.Linear-style uniform init), rounded
    once to `weight_dtype` (the fused weight is the dominant HBM stream), then
    packed into W_fused: (H*I, H*O) causal + b_fused: (H*O,).  Also returns the
    per-step (f32-upcast) weights/biases so the pure-JAX reference uses the
    *identical* values the kernel sees."""
    D = H * I
    kw, kb = jax.random.split(key)
    cols, biases, unpadded = [], [], []
    for t in range(H):
        fan_in = (t + 1) * I
        bound = 1.0 / math.sqrt(fan_in)
        wt = jax.random.uniform(jax.random.fold_in(kw, t), (fan_in, O),
                                jnp.float32, -bound, bound)
        wt = wt.astype(weight_dtype).astype(jnp.float32)   # round-trip once
        bt = jax.random.uniform(jax.random.fold_in(kb, t), (O,),
                                jnp.float32, -bound, bound)
        unpadded.append(wt)
        biases.append(bt)
        cols.append(jnp.pad(wt, ((0, D - fan_in), (0, 0))))   # (D, O)
    W_fused = jnp.concatenate(cols, axis=1).astype(weight_dtype)   # (D, H*O)
    b_fused = jnp.concatenate(biases, axis=0)                      # (H*O,)
    return W_fused, b_fused, unpadded, biases


def reference_forward(x, unpadded_W, biases):
    """Pure-JAX reference matching the PyTorch loop exactly."""
    B, H, I = x.shape
    outs = []
    for t in range(H):
        xt = x[:, : t + 1].reshape(B, -1)            # (B, (t+1)*I)
        outs.append(jnp.dot(xt, unpadded_W[t],
                            precision=jax.lax.Precision.HIGHEST) + biases[t])
    return jnp.stack(outs, axis=1)                   # (B, H, O)


if __name__ == "__main__":
    B, H, I, O = 8, 16, 16, 16   # batch, horizon, input_size, output_size

    key = jax.random.PRNGKey(0)
    kx, kp = jax.random.split(key)
    x = jax.random.normal(kx, (B, H, I), dtype=jnp.float32)

    W_fused, b_fused, unpadded_W, biases = build_params(kp, H, I, O)
    ref = reference_forward(x, unpadded_W, biases)

    # Default path: D = N = 256 is small -> one full-block grid step.
    out_full = resid_linear_regression_forward(x, W_fused, b_fused)
    out_full = jax.block_until_ready(out_full)
    assert out_full.shape == (B, H, O)
    err_full = float(jnp.max(jnp.abs(out_full - ref)))
    assert jnp.allclose(out_full, ref, atol=1e-4, rtol=1e-4), \
        f"full-block max err {err_full}"

    # Forced 128-tiles: exercises the compressed causal grid (3 of 4 weight
    # tiles are non-zero; the structurally-zero (n=0, k=1) tile never enters
    # the grid) and the VMEM-resident-x dynamic K indexing.
    out_tiled = resid_linear_regression_forward(x, W_fused, b_fused,
                                                tile_k=128, tile_n=128)
    out_tiled = jax.block_until_ready(out_tiled)
    err_tiled = float(jnp.max(jnp.abs(out_tiled - ref)))
    assert jnp.allclose(out_tiled, ref, atol=1e-4, rtol=1e-4), \
        f"tiled max err {err_tiled}"

    print("KERNEL_OK")
</pallas_src>

<mosaic_0001>
module attributes {stable_mosaic.version = 11 : i64} {
  func.func @resid_fused_kernel(%arg0: i32, %arg1: memref<1xi32, #tpu.memory_space<smem>>, %arg2: memref<1xi32, #tpu.memory_space<smem>>, %arg3: memref<1x8x256xf32, #tpu.memory_space<vmem>>, %arg4: memref<256x256xbf16, #tpu.memory_space<vmem>>, %arg5: memref<1x256xf32, #tpu.memory_space<vmem>>, %arg6: memref<8x256xf32, #tpu.memory_space<vmem>>) attributes {dimension_semantics = [#tpu.dimension_semantics<arbitrary>], iteration_bounds = array<i64: 1>, scalar_prefetch = 2 : i64, scratch_operands = 0 : i64, tpu.core_type = #tpu.core_type<tc>, window_params = [{pipeline_mode = #tpu.pipeline_mode<synchronous>, transform_indices = @transform_0, window_bounds = array<i64: 1, 8, 256>}, {transform_indices = @transform_1, window_bounds = array<i64: 256, 256>}, {transform_indices = @transform_2, window_bounds = array<i64: 1, 256>}, {transform_indices = @transform_3, window_bounds = array<i64: 8, 256>}]} {
    %0 = arith.index_cast %arg0 : i32 to index
    %1 = memref.load %arg2[%0] : memref<1xi32, #tpu.memory_space<smem>>
    %c0_i32 = arith.constant 0 : i32
    %2 = arith.cmpi eq, %1, %c0_i32 : i32
    %3 = arith.extui %2 : i1 to i32
    %c0_i32_0 = arith.constant 0 : i32
    %4 = arith.cmpi ne, %3, %c0_i32_0 : i32
    scf.if %4 {
      %c0_8 = arith.constant 0 : index
      %c0_9 = arith.constant 0 : index
      %14 = vector.load %arg5[%c0_8, %c0_9] : memref<1x256xf32, #tpu.memory_space<vmem>>, vector<1x256xf32>
      %15 = vector.shape_cast %14 : vector<1x256xf32> to vector<1x256xf32>
      %16 = vector.broadcast %15 : vector<1x256xf32> to vector<8x256xf32>
      %c0_10 = arith.constant 0 : index
      %c0_11 = arith.constant 0 : index
      %17 = vector.load %arg6[%c0_10, %c0_11] : memref<8x256xf32, #tpu.memory_space<vmem>>, vector<8x256xf32>
      tpu.vector_store %arg6[%c0_10, %c0_11], %16 {strides = array<i32>} : memref<8x256xf32, #tpu.memory_space<vmem>>, vector<8x256xf32>,
    } else {
    }
    %5 = arith.index_cast %1 : i32 to index
    %c0 = arith.constant 0 : index
    %c0_1 = arith.constant 0 : index
    %6 = vector.load %arg3[%5, %c0, %c0_1] : memref<1x8x256xf32, #tpu.memory_space<vmem>>, vector<1x8x256xf32>
    %7 = vector.shape_cast %6 : vector<1x8x256xf32> to vector<8x256xf32>
    %c0_2 = arith.constant 0 : index
    %c0_3 = arith.constant 0 : index
    %8 = vector.load %arg6[%c0_2, %c0_3] : memref<8x256xf32, #tpu.memory_space<vmem>>, vector<8x256xf32>
    %c0_4 = arith.constant 0 : index
    %c0_5 = arith.constant 0 : index
    %9 = vector.load %arg4[%c0_4, %c0_5] : memref<256x256xbf16, #tpu.memory_space<vmem>>, vector<256x256xbf16>
    %10 = arith.extf %9 : vector<256x256xbf16> to vector<256x256xf32>
    %cst = arith.constant dense<0.000000e+00> : vector<8x256xf32>
    %11 = tpu.matmul %7, %10, %cst {dimension_numbers = #tpu.dot_dimension_numbers<[1], [0], [0], [1], [0, 0, 1, 1], [], []>} : vector<8x256xf32>, vector<256x256xf32>, vector<8x256xf32> -> vector<8x256xf32>
    %12 = arith.addf %8, %11 : vector<8x256xf32>
    %c0_6 = arith.constant 0 : index
    %c0_7 = arith.constant 0 : index
    %13 = vector.load %arg6[%c0_6, %c0_7] : memref<8x256xf32, #tpu.memory_space<vmem>>, vector<8x256xf32>
    tpu.vector_store %arg6[%c0_6, %c0_7], %12 {strides = array<i32>} : memref<8x256xf32, #tpu.memory_space<vmem>>, vector<8x256xf32>,
    return
  }
  func.func @transform_0(%arg0: i32, %arg1: memref<1xi32, #tpu.memory_space<smem>>, %arg2: memref<1xi32, #tpu.memory_space<smem>>) -> (i32, i32, i32) {
    %c0_i32 = arith.constant 0 : i32
    %c0_i32_0 = arith.constant 0 : i32
    %c0_i32_1 = arith.constant 0 : i32
    %c0_i32_2 = arith.constant 0 : i32
    return %c0_i32, %c0_i32_0, %c0_i32_1 : i32, i32, i32
  }
  func.func @transform_1(%arg0: i32, %arg1: memref<1xi32, #tpu.memory_space<smem>>, %arg2: memref<1xi32, #tpu.memory_space<smem>>) -> (i32, i32) {
    %0 = arith.index_cast %arg0 : i32 to index
    %1 = memref.load %arg2[%0] : memref<1xi32, #tpu.memory_space<smem>>
    %2 = arith.index_cast %arg0 : i32 to index
    %3 = memref.load %arg1[%2] : memref<1xi32, #tpu.memory_space<smem>>
    %c0_i32 = arith.constant 0 : i32
    return %1, %3 : i32, i32
  }
  func.func @transform_2(%arg0: i32, %arg1: memref<1xi32, #tpu.memory_space<smem>>, %arg2: memref<1xi32, #tpu.memory_space<smem>>) -> (i32, i32) {
    %0 = arith.index_cast %arg0 : i32 to index
    %1 = memref.load %arg1[%0] : memref<1xi32, #tpu.memory_space<smem>>
    %c0_i32 = arith.constant 0 : i32
    %c0_i32_0 = arith.constant 0 : i32
    return %c0_i32, %1 : i32, i32
  }
  func.func @transform_3(%arg0: i32, %arg1: memref<1xi32, #tpu.memory_space<smem>>, %arg2: memref<1xi32, #tpu.memory_space<smem>>) -> (i32, i32) {
    %0 = arith.index_cast %arg0 : i32 to index
    %1 = memref.load %arg1[%0] : memref<1xi32, #tpu.memory_space<smem>>
    %c0_i32 = arith.constant 0 : i32
    %c0_i32_0 = arith.constant 0 : i32
    return %c0_i32, %1 : i32, i32
  }
}

</mosaic_0001>

<bundles_post_ra>
// kernel: tpu_custom_call.1
= control target key start
LH: loop header
LB: loop body
LE: loop exit
PB: predicated region body
PF: predicated region fallthrough
CT: control target
= control target key end

     0   :  { %s629_s0 = inlined_call_operand.<no memory space> [shape: s32[1], index: 0, kind: input, shape index: {}]   ;;  %s630_s1 = inlined_call_operand.<no memory space> [shape: s32[1], index: 1, kind: input, shape index: {}]   ;;  %s631_s2 = inlined_call_operand.hbm [shape: f32[1,8,256], index: 2, kind: input, shape index: {}]   ;;  %s632_s3 = inlined_call_operand.hbm [shape: bf16[256,256], index: 3, kind: input, shape index: {}]   ;;  %s633_s4 = inlined_call_operand.vmem [shape: f32[1,256], index: 4, kind: input, shape index: {}]   ;;  %s634_s5 = inlined_call_operand.hbm [shape: f32[8,256], index: 5, kind: output, shape index: {}]  }
   0x1   :  { %10 = sst [smem:[#allocation3]] %s629_s0 }
   0x2   :  { %12 = vsyncpa [#allocation6], 0 }
   0x3   :  { %13 = vsyncpa [#allocation9], 0 }
   0x4   :  { %14 = vsyncpa [#allocation7], 0  ;;  %s28_s20 = sld [smem:[#allocation3]]  ;;  %s545_s21 = smov [#allocation5]  }
   0x5   :  { %s21_s22 = sshll.u32 %s545_s21, 4  ;;  %s469_s25 = scalar_lea.hbm %s631_s2, 256  ;;  %s22_s22 = int_to_ptr.vmem [resolvable:$true] %s21_s22 }
   0x6   :  { %p470_p0 = scmp.ne.s32.totalorder %s631_s2, %s469_s25  ;;  %p473_p1 = scmp.lt.u32.totalorder %s469_s25, %s631_s2 }
   0x8   :  { %p475_p2 = pnand %p473_p1, %p470_p0 }
   0xa   :  { %478 = shalt.err (!%p475_p2)
}
   0xb   :  { %s479_s0 = scalar_lea.vmem %s22_s22, 256  ;;  %p484_p4 = scmp.lt.s32.totalorder %s22_s22, %s22_s22 }
   0xc   :  { %p480_p3 = scmp.ne.s32.totalorder %s22_s22, %s479_s0  ;;  %p485_p5 = scmp.lt.s32.totalorder %s479_s0, %s479_s0 }
   0xe   :  { %p486_p6 = por %p485_p5, %p484_p4 }
  0x10   :  { %p487_p7 = pnand %p486_p6, %p480_p3 }
  0x12   :  { %490 = shalt.err (!%p487_p7)
}
  0x13   :  { %24 = dma.hbm_to_vmem [thread:$0]  %s631_s2, 256, %s22_s22, [#allocation6]  }
  0x14   :  { %s317_s9 = sshll.u32 %s630_s1, 6  ;;  %s546_s10 = smov [#allocation8]  }
  0x15   :  { %s38_s11 = sshll.u32 %s546_s10, 4  ;;  %s308_s12 = sshll.u32 %s28_s20, 1  ;;  %s39_s11 = int_to_ptr.vmem [resolvable:$true] %s38_s11 }
  0x16   :  { %s35_s13 = sadd.s32 %s317_s9, %s308_s12  ;;  %s493_s2 = scalar_lea.hbm %s632_s3, 4096 }
  0x17   :  { %s310_s14 = sshll.u32 %s35_s13, 6 }
  0x18   :  { %s37_s17 = scalar_lea.hbm %s632_s3, %s310_s14 }
  0x19   :  { %s491_s18 = scalar_lea.hbm %s37_s17, 4096  ;;  %p494_p9 = scmp.lt.u32.totalorder %s37_s17, %s632_s3 }
  0x1a   :  { %p492_p8 = scmp.ne.s32.totalorder %s37_s17, %s491_s18  ;;  %p495_p10 = scmp.lt.u32.totalorder %s493_s2, %s491_s18 }
  0x1b   :  { %p497_p12 = scmp.lt.u32.totalorder %s491_s18, %s37_s17 }
  0x1c   :  { %p496_p11 = por %p495_p10, %p494_p9 }
  0x1e   :  { %p498_p13 = por %p497_p12, %p496_p11 }
  0x20   :  { %p499_p0 = pnand %p498_p13, %p492_p8 }
  0x22   :  { %502 = shalt.err (!%p499_p0)
}
  0x23   :  { %s503_s20 = scalar_lea.vmem %s39_s11, 4096  ;;  %p508_p2 = scmp.lt.s32.totalorder %s39_s11, %s39_s11 }
  0x24   :  { %p504_p1 = scmp.ne.s32.totalorder %s39_s11, %s503_s20  ;;  %p509_p3 = scmp.lt.s32.totalorder %s503_s20, %s503_s20 }
  0x26   :  { %p510_p4 = por %p509_p3, %p508_p2 }
  0x28   :  { %p511_p5 = pnand %p510_p4, %p504_p1 }
  0x2a   :  { %514 = shalt.err (!%p511_p5)
}
  0x2b   :  { %s547_s24 = smov 128   ;;  %s548_s25 = smov 8  }
  0x2c   :  { %44 = dma.hbm_to_vmem [thread:$0]  %s37_s17, 4096, %s39_s11, [#allocation9], %s547_s24, %s547_s24, %s548_s25  }
  0x2d   :  { %539 = dma.done.wait [#allocation6], 256  }
  0x2e   :  { %540 = vsyncadd [#allocation6], 4294967040 }
  0x2f   :  { %541 = dma.done.wait [#allocation9], 4096  }
  0x30   :  { %542 = vsyncadd [#allocation9], 4294963200  ;;  %s69_s3 = sld [smem:[#allocation3]]  ;;  %p312_p7 = scmp.ne.s32.totalorder %s630_s1, 0 }
  0x31   :  { %v85_v0 = vlaneseq (!%p312_p7) }
  0x33   :  { %v86_v1 = vshrl.u32 (!%p312_p7), %v85_v0, 7 }
  0x34   :  { %82 = sbr.rel (%p312_p7) target bundleno = 63 (0x3f), region = 25 }
  0x35   :  { %v87_v3 = vsub.s32 (!%p312_p7), 0, %v86_v1  ;;  %v91_v4 = vsub.s32 (!%p312_p7), 1, %v86_v1 }
  0x36   :  { %s311_s26 = sshll.u32 %s69_s3, 1 }
  0x37   :  { %p71_p6 = scmp.lt.s32.totalorder %s311_s26, 1 }
  0x39   :  { %s636_s26 = smov (!%p71_p6, %s311_s26), 1 }
  0x3a   :  { %s73_s29 = scalar_lea.vmem %s633_s4, %s636_s26 }
  0x3b   :  { %v83_v2 = vld [vmem:[%s73_s29] sm:$0x3] }
  0x3c   :  { %v88_v5 = vrot.slane %v83_v2, %v87_v3  ;;  %v92_v6 = vrot.slane %v83_v2, %v91_v4 }
  0x3e   :  { %95 = vst [vmem:[#allocation10] sm:$0xff] %v88_v5  ;;  %96 = vst [vmem:[#allocation10 + $0x8] sm:$0xff] %v92_v6 }
  0x3f PF:  { %v421_v7 = vld [vmem:[#allocation8 + $0x4] ss:$8 sps:$4 sm:$0xff]   ;;  %v423_v8 = vld [vmem:[#allocation8] ss:$8 sps:$4 sm:$0xff]   ;;  %v424_v9 = vld [vmem:[#allocation8 + $0x14] ss:$8 sps:$4 sm:$0xff]  }
  0x40   :  { %321 = vmatprep.subr.bf16.mxu0 %v421_v7  ;;  %v426_v10 = vld [vmem:[#allocation8 + $0x10] ss:$8 sps:$4 sm:$0xff]   ;;  %v427_v11 = vld [vmem:[#allocation8 + $0x24] ss:$8 sps:$4 sm:$0xff]   ;;  %v429_v12 = vld [vmem:[#allocation8 + $0x20] ss:$8 sps:$4 sm:$0xff]  }
  0x41   :  { %323 = vmatpush1.bf16.msra.mxu0 %v423_v8  ;;  %v430_v13 = vld [vmem:[#allocation8 + $0x34] ss:$8 sps:$4 sm:$0xff]   ;;  %v432_v14 = vld [vmem:[#allocation8 + $0x30] ss:$8 sps:$4 sm:$0xff]   ;;  %v433_v15 = vld [vmem:[#allocation8 + $0x44] ss:$8 sps:$4 sm:$0xff]  }
  0x42   :  { %325 = vmatprep.subr.bf16.mxu0 %v424_v9  ;;  %v435_v16 = vld [vmem:[#allocation8 + $0x40] ss:$8 sps:$4 sm:$0xff]   ;;  %s318_s7 = sshll.u32 %s630_s1, 4  ;;  %v436_v17 = vld [vmem:[#allocation8 + $0x54] ss:$8 sps:$4 sm:$0xff]   ;;  %s277_s1 = sld [smem:[#allocation3]] }
  0x43   :  { %v438_v18 = vld [vmem:[#allocation8 + $0x50] ss:$8 sps:$4 sm:$0xff]   ;;  %v439_v19 = vld [vmem:[#allocation8 + $0x64] ss:$8 sps:$4 sm:$0xff]   ;;  %s616_s8 = scalar_lea.vmem [#allocation5], %s318_s7  ;;  %s549_s10 = smov [#allocation10]  }
  0x44   :  { %v101_v20 = vld [vmem:[%s616_s8 + $0x8] sm:$0xff]  ;;  %v441_v21 = vld [vmem:[#allocation8 + $0x60] ss:$8 sps:$4 sm:$0xff]   ;;  %v445_v24 = vld [vmem:[#allocation8 + $0x84] ss:$8 sps:$4 sm:$0xff]   ;;  %s285_s11 = sshll.u32 %s549_s10, 4  ;;  %s286_s11 = int_to_ptr.vmem [resolvable:$true] %s285_s11 }
  0x45   :  { %327 = vmatpush1.bf16.msra.mxu0 %v426_v10  ;;  %264 = vmatprep.mubr.f32.mxu0 %v101_v20  ;;  %v442_v22 = vld [vmem:[#allocation8 + $0x74] ss:$8 sps:$4 sm:$0xff]   ;;  %v444_v23 = vld [vmem:[#allocation8 + $0x70] ss:$8 sps:$4 sm:$0xff]   ;;  %v447_v25 = vld [vmem:[#allocation8 + $0x80] ss:$8 sps:$4 sm:$0xff]   ;;  %p520_p9 = scmp.lt.s32.totalorder %s286_s11, %s286_s11 }
  0x46   :  { %329 = vmatprep.subr.bf16.mxu0 %v427_v11  ;;  %v448_v26 = vld [vmem:[#allocation8 + $0x94] ss:$8 sps:$4 sm:$0xff]   ;;  %v450_v27 = vld [vmem:[#allocation8 + $0x90] ss:$8 sps:$4 sm:$0xff]   ;;  %v451_v28 = vld [vmem:[#allocation8 + $0xa4] ss:$8 sps:$4 sm:$0xff]  }
  0x47   :  { %v453_v29 = vld [vmem:[#allocation8 + $0xa0] ss:$8 sps:$4 sm:$0xff]   ;;  %v454_v30 = vld [vmem:[#allocation8 + $0xb4] ss:$8 sps:$4 sm:$0xff]   ;;  %v456_v31 = vld [vmem:[#allocation8 + $0xb0] ss:$8 sps:$4 sm:$0xff]  }
  0x48   :  { %v457_v32 = vld [vmem:[#allocation8 + $0xc4] ss:$8 sps:$4 sm:$0xff]   ;;  %v459_v33 = vld [vmem:[#allocation8 + $0xc0] ss:$8 sps:$4 sm:$0xff]   ;;  %v460_v34 = vld [vmem:[#allocation8 + $0xd4] ss:$8 sps:$4 sm:$0xff]  }
  0x49   :  { %331 = vmatpush1.bf16.msra.mxu0 %v429_v12  ;;  %v462_v35 = vld [vmem:[#allocation8 + $0xd0] ss:$8 sps:$4 sm:$0xff]   ;;  %v463_v36 = vld [vmem:[#allocation8 + $0xe4] ss:$8 sps:$4 sm:$0xff]   ;;  %v465_v37 = vld [vmem:[#allocation8 + $0xe0] ss:$8 sps:$4 sm:$0xff]  }
  0x4a   :  { %333 = vmatprep.subr.bf16.mxu0 %v430_v13  ;;  %v466_v38 = vld [vmem:[#allocation8 + $0xf4] ss:$8 sps:$4 sm:$0xff]   ;;  %v468_v39 = vld [vmem:[#allocation8 + $0xf0] ss:$8 sps:$4 sm:$0xff]   ;;  %v102_v41 = vld [vmem:[#allocation10] sm:$0xff]  ;;  %s319_s9 = sshll.u32 %s277_s1, 8 }
  0x4b   :  { %v100_v40 = vld [vmem:[%s616_s8] sm:$0xff]  ;;  %v103_v42 = vld [vmem:[#allocation10 + $0x8] sm:$0xff]  ;;  %s283_s14 = scalar_lea.hbm %s634_s5, %s319_s9  ;;  %s515_s15 = scalar_lea.vmem %s286_s11, 256 }
  0x4c   :  { %p516_p8 = scmp.ne.s32.totalorder %s286_s11, %s515_s15  ;;  %p521_p10 = scmp.lt.s32.totalorder %s515_s15, %s515_s15 }
  0x4d   :  { %335 = vmatpush1.bf16.msra.mxu0 %v432_v14 }
  0x4e   :  { %337 = vmatprep.subr.bf16.mxu0 %v433_v15  ;;  %p522_p11 = por %p521_p10, %p520_p9 }
  0x50   :  { %p523_p12 = pnand %p522_p11, %p516_p8 }
  0x51   :  { %339 = vmatpush1.bf16.msra.mxu0 %v435_v16 }
  0x52   :  { %341 = vmatprep.subr.bf16.mxu0 %v436_v17 }
  0x55   :  { %343 = vmatpush1.bf16.msra.mxu0 %v438_v18 }
  0x56   :  { %345 = vmatprep.subr.bf16.mxu0 %v439_v19 }
  0x59   :  { %347 = vmatpush1.bf16.msra.mxu0 %v441_v21 }
  0x5a   :  { %349 = vmatprep.subr.bf16.mxu0 %v442_v22 }
  0x5d   :  { %351 = vmatpush1.bf16.msra.mxu0 %v444_v23 }
  0x5e   :  { %353 = vmatprep.subr.bf16.mxu0 %v445_v24 }
  0x61   :  { %355 = vmatpush1.bf16.msra.mxu0 %v447_v25 }
  0x62   :  { %357 = vmatprep.subr.bf16.mxu0 %v448_v26 }
  0x65   :  { %359 = vmatpush1.bf16.msra.mxu0 %v450_v27 }
  0x66   :  { %361 = vmatprep.subr.bf16.mxu0 %v451_v28 }
  0x69   :  { %363 = vmatpush1.bf16.msra.mxu0 %v453_v29 }
  0x6a   :  { %365 = vmatprep.subr.bf16.mxu0 %v454_v30 }
  0x6d   :  { %367 = vmatpush1.bf16.msra.mxu0 %v456_v31 }
  0x6e   :  { %369 = vmatprep.subr.bf16.mxu0 %v457_v32 }
  0x71   :  { %371 = vmatpush1.bf16.msra.mxu0 %v459_v33 }
  0x72   :  { %373 = vmatprep.subr.bf16.mxu0 %v460_v34 }
  0x75   :  { %375 = vmatpush1.bf16.msra.mxu0 %v462_v35 }
  0x76   :  { %377 = vmatprep.subr.bf16.mxu0 %v463_v36 }
  0x79   :  { %379 = vmatpush1.bf16.msra.mxu0 %v465_v37 }
  0x7a   :  { %381 = vmatprep.subr.bf16.mxu0 %v466_v38 }
  0x7d   :  { %383 = vmatpush1.bf16.msra.mxu0 %v468_v39 }
  0x80   :  { %265 = vmatmul.mubr.f32.vlgmr.msra.gmra.mrb[0].mxu0 %v100_v40 }
 0x153   :  { %v266_v43 = vpop.f32.mrb[0].mxu0 }
 0x154   :  { %v271_v44 = vadd.f32 %v266_v43, %v102_v41  ;;  %v268_v45 = vpop.f32.mrb[1].mxu0 }
 0x155   :  { %v272_v46 = vadd.f32 %v268_v45, %v103_v42 }
 0x156   :  { %273 = vst [vmem:[#allocation10] sm:$0xff] %v271_v44 }
 0x157   :  { %274 = vst [vmem:[#allocation10 + $0x8] sm:$0xff] %v272_v46 }
 0x158   :  { %526 = shalt.err (!%p523_p12)
}
 0x159   :  { %s527_s16 = scalar_lea.hbm %s283_s14, 256  ;;  %s529_s19 = scalar_lea.hbm %s634_s5, 256 }
 0x15a   :  { %p528_p13 = scmp.ne.s32.totalorder %s283_s14, %s527_s16  ;;  %p530_p0 = scmp.lt.u32.totalorder %s283_s14, %s634_s5 }
 0x15b   :  { %p531_p1 = scmp.lt.u32.totalorder %s529_s19, %s527_s16  ;;  %p533_p3 = scmp.lt.u32.totalorder %s527_s16, %s283_s14 }
 0x15d   :  { %p532_p2 = por %p531_p1, %p530_p0 }
 0x15f   :  { %p534_p4 = por %p533_p3, %p532_p2 }
 0x161   :  { %p535_p5 = pnand %p534_p4, %p528_p13 }
 0x163   :  { %538 = shalt.err (!%p535_p5)
}
 0x164   :  { %288 = dma.vmem_to_hbm [thread:$0]  %s286_s11, 256, %s283_s14, [#allocation7]  }
 0x165   :  { %543 = dma.done.wait [#allocation7], 256  }
 0x166   :  { %544 = vsyncadd [#allocation7], 4294967040 }
 0x167   :  { %292 = vsyncpa [#allocation6], 1 }
 0x168   :  { %293 = vsyncpa [#allocation9], 1 }
 0x169   :  { %294 = vsyncpa [#allocation7], 1 }

</bundles_post_ra>
